<compile_context>
chip_gen: v6e
topology: v6e:2x2x1
jax: 0.10.0
libtpu: 0.0.40
codegen_flags: <defaults>
</compile_context>

<pallas_src>
import functools

import jax
import jax.numpy as jnp
import numpy as np
from jax import lax
from jax.experimental import pallas as pl
from jax.experimental.pallas import tpu as pltpu


# ---------------------------------------------------------------------------
# Kernel 1: fused init — row-wise L2 normalization written to two identical
#           outputs (live bank + lagging copy).  Equivalent to
#           F.normalize(bank, dim=0) in the torch (dim, size) layout.
# ---------------------------------------------------------------------------
def _init_normalize_kernel(x_ref, bank_ref, copy_ref):
    x = x_ref[...]
    sq = jnp.sum(x * x, axis=-1, keepdims=True)          # lane-axis reduce
    inv = lax.rsqrt(jnp.maximum(sq, 1e-24))               # == 1/max(||x||,1e-12), EUP slot
    y = x * inv
    bank_ref[...] = y
    copy_ref[...] = y


def _row_tile(size, dim, itemsize, per_buffer_bytes=2 * 1024 * 1024):
    """Largest row tile (multiple of 8, <= 2048) keeping each VMEM buffer under a
    ~2 MiB budget.  With 1 input + 2 outputs double-buffered (6 buffers) this stays
    well inside the 32 MiB default scoped VMEM on v5e/v6e/v7x."""
    if size <= 256:
        return size
    cap = max(8, per_buffer_bytes // max(1, dim * itemsize))
    ts = int(min(size, cap, 2048))
    return max(8, (ts // 8) * 8)


def init_normalized_bank(raw):
    size, dim = raw.shape
    ts = _row_tile(size, dim, raw.dtype.itemsize)
    spec = pl.BlockSpec((ts, dim), lambda i: (i, 0))
    out_sd = jax.ShapeDtypeStruct((size, dim), raw.dtype)
    return pl.pallas_call(
        _init_normalize_kernel,
        out_shape=(out_sd, out_sd),
        grid=(pl.cdiv(size, ts),),
        in_specs=[spec],
        out_specs=(spec, spec),
        compiler_params=pltpu.CompilerParams(dimension_semantics=("parallel",)),
    )(raw)


# ---------------------------------------------------------------------------
# Kernel 2: O(batch) dequeue-and-enqueue.  The bank lives in HBM and the output
#           aliases it; the kernel DMAs only
#             (a) the previous update ("fix"), replaying it into the lagging buffer,
#             (b) the current batch ("cur"),
#           each at a dynamic row offset.  Untouched rows keep their values.
# ---------------------------------------------------------------------------
def _enqueue_kernel(ptrs_ref, fix_ref, cur_ref, bank_hbm_ref, out_hbm_ref, sem):
    del bank_hbm_ref  # same HBM buffer as out_hbm_ref (input_output_aliases)
    kf = fix_ref.shape[0]
    kc = cur_ref.shape[0]
    fix_copy = pltpu.make_async_copy(
        fix_ref, out_hbm_ref.at[pl.ds(ptrs_ref[0], kf), :], sem.at[0])
    fix_copy.start()
    fix_copy.wait()  # must land before `cur` in case the two regions overlap
    cur_copy = pltpu.make_async_copy(
        cur_ref, out_hbm_ref.at[pl.ds(ptrs_ref[1], kc), :], sem.at[1])
    cur_copy.start()
    cur_copy.wait()


@functools.partial(jax.jit, donate_argnums=(0,))
def _enqueue(bank, fix, cur, ptrs):
    size, dim = bank.shape
    kf = fix.shape[0]
    kc = cur.shape[0]
    return pl.pallas_call(
        _enqueue_kernel,
        out_shape=jax.ShapeDtypeStruct((size, dim), bank.dtype),
        grid_spec=pltpu.PrefetchScalarGridSpec(
            num_scalar_prefetch=1,                  # ptrs -> SMEM
            grid=(1,),
            in_specs=[
                pl.BlockSpec((kf, dim), lambda i, p: (0, 0)),   # fix rows (VMEM)
                pl.BlockSpec((kc, dim), lambda i, p: (0, 0)),   # cur rows (VMEM)
                pl.BlockSpec(memory_space=pl.ANY),              # bank stays in HBM
            ],
            out_specs=pl.BlockSpec(memory_space=pl.ANY),
            scratch_shapes=[pltpu.SemaphoreType.DMA((2,))],
        ),
        # Operands are (ptrs, fix, cur, bank): bank (index 3) aliases output 0, so the
        # update is in place (buffer donated by the surrounding jit).
        input_output_aliases={3: 0},
        compiler_params=pltpu.CompilerParams(dimension_semantics=("arbitrary",)),
    )(ptrs, fix, cur, bank)


# ---------------------------------------------------------------------------
# Module wrapper (stateful glue, mirrors the PyTorch class).
# ---------------------------------------------------------------------------
class MemoryBankModule:
    """JAX/Pallas port of lightly's MemoryBankModule.

    forward(output, labels=None, update=False) -> (output, bank)
      * bank has shape (size, dim): row i is the i-th stored key (== torch bank.T).
      * bank is the state *before* this call's update (torch's .clone()).  With the
        O(batch) in-place update path, a returned bank is guaranteed valid only until
        the next forward(update=True) call.
    """

    def __init__(self, size: int = 2 ** 16):
        if size < 0:
            raise ValueError(f"Illegal memory bank size {size}, must be non-negative.")
        self.size = size
        self.bank = None        # (size, dim) — current contents
        self.bank_ptr = None    # host-side int (torch keeps a LongTensor)
        self._stale = None      # lagging buffer, recycled (donated) at each update
        self._pending = None    # (rows, ptr) of the last update, not yet in _stale

    def _init_memory_bank(self, dim: int):
        # torch.randn(dim, size) then normalize(dim=0), here in (size, dim) layout.
        raw = jax.random.normal(jax.random.PRNGKey(42), (self.size, dim), dtype=jnp.float32)
        self.bank, self._stale = init_normalized_bank(raw)
        self.bank_ptr = 0
        self._pending = None

    def _dequeue_and_enqueue(self, batch):
        batch_size = batch.shape[0]
        ptr = int(self.bank_ptr)
        if ptr + batch_size >= self.size:
            cur = batch[: self.size - ptr]   # torch drops the batch tail on wrap
            next_ptr = 0
        else:
            cur = batch
            next_ptr = ptr + batch_size
        # Replay the previous update so the lagging buffer catches up to the current
        # state, then apply this update.  First-ever update: replay == current write
        # (idempotent), keeping the kernel signature static.
        fix, fix_ptr = self._pending if self._pending is not None else (cur, ptr)
        ptrs = jnp.array([fix_ptr, ptr], dtype=jnp.int32)
        new_bank = _enqueue(self._stale, fix, cur, ptrs)
        self._stale = self.bank          # becomes the lagging buffer (donated next time)
        self._pending = (cur, ptr)
        self.bank = new_bank
        self.bank_ptr = next_ptr

    def forward(self, output, labels=None, update: bool = False):
        if self.size == 0:
            return output, None
        _, dim = output.shape
        if self.bank is None:
            self._init_memory_bank(dim)
        bank = self.bank                 # pre-update snapshot (immutable, no copy)
        if update:
            self._dequeue_and_enqueue(output)
        return output, bank


if __name__ == "__main__":
    batch, dim, bank_size = 8, 128, 512
    output = jax.random.normal(jax.random.PRNGKey(0), (batch, dim), dtype=jnp.float32)

    module = MemoryBankModule(size=bank_size)

    # First forward (with update): returns output unchanged + the pre-update bank.
    out1, bank1 = module.forward(output, update=True)
    out1, bank1 = jax.block_until_ready((out1, bank1))
    assert out1.shape == (batch, dim) and out1.dtype == jnp.float32
    assert bank1.shape == (bank_size, dim) and bank1.dtype == jnp.float32
    row_norms = jnp.linalg.norm(bank1, axis=1)
    assert jnp.allclose(row_norms, 1.0, atol=1e-4), "initial bank keys not unit norm"

    # Second forward (no update): bank now holds the first batch at rows [0, batch).
    out2, bank2 = module.forward(output, update=False)
    bank2 = jax.block_until_ready(bank2)
    assert jnp.allclose(bank2[:batch], output, atol=1e-6), "enqueue mismatch"
    assert jnp.allclose(bank2[batch:], bank1[batch:], atol=1e-6), "untouched rows changed"
    assert module.bank_ptr == batch

    # Longer run: steady-state updates incl. wrap-around, checked against NumPy.
    # (Snapshot bank2 to host first: older snapshots are recycled after later updates.)
    ref_bank = np.array(bank2)
    ref_ptr = module.bank_ptr
    n_steps = 70
    batches = jax.random.normal(jax.random.PRNGKey(1), (n_steps, batch, dim), jnp.float32)
    batches_np = np.array(batches)
    for t in range(n_steps):
        if ref_ptr + batch >= bank_size:
            k = bank_size - ref_ptr
            ref_bank[ref_ptr:] = batches_np[t, :k]
            ref_ptr = 0
        else:
            ref_bank[ref_ptr:ref_ptr + batch] = batches_np[t]
            ref_ptr += batch
        module.forward(batches[t], update=True)

    _, final_bank = module.forward(output, update=False)
    final_bank = jax.block_until_ready(final_bank)
    assert module.bank_ptr == ref_ptr
    assert jnp.allclose(final_bank, ref_bank, atol=1e-6), "bank diverged from reference"

    # size == 0 path: memory bank disabled.
    empty = MemoryBankModule(size=0)
    o, b = empty.forward(output)
    assert b is None

    print("KERNEL_OK")
</pallas_src>

<mosaic_0001>
module attributes {stable_mosaic.version = 11 : i64} {
  func.func @_init_normalize_kernel(%arg0: i32, %arg1: memref<512x128xf32, #tpu.memory_space<vmem>>, %arg2: memref<512x128xf32, #tpu.memory_space<vmem>>, %arg3: memref<512x128xf32, #tpu.memory_space<vmem>>) attributes {dimension_semantics = [#tpu.dimension_semantics<parallel>], iteration_bounds = array<i64: 1>, scalar_prefetch = 0 : i64, scratch_operands = 0 : i64, tpu.core_type = #tpu.core_type<tc>, window_params = [{transform_indices = @transform_0, window_bounds = array<i64: 512, 128>}, {transform_indices = @transform_1, window_bounds = array<i64: 512, 128>}, {transform_indices = @transform_2, window_bounds = array<i64: 512, 128>}]} {
    %c0 = arith.constant 0 : index
    %c0_0 = arith.constant 0 : index
    %0 = vector.load %arg1[%c0, %c0_0] : memref<512x128xf32, #tpu.memory_space<vmem>>, vector<512x128xf32>
    %1 = arith.mulf %0, %0 : vector<512x128xf32>
    %cst = arith.constant dense<0.000000e+00> : vector<512xf32>
    %2 = vector.multi_reduction <add>, %1, %cst [1] : vector<512x128xf32> to vector<512xf32>
    %3 = vector.shape_cast %2 : vector<512xf32> to vector<512x1xf32>
    %cst_1 = arith.constant 1.000000e-24 : f32
    %4 = vector.broadcast %cst_1 : f32 to vector<512x1xf32>
    %5 = arith.maximumf %3, %4 : vector<512x1xf32>
    %6 = math.rsqrt %5 : vector<512x1xf32>
    %7 = vector.broadcast %6 : vector<512x1xf32> to vector<512x128xf32>
    %8 = arith.mulf %0, %7 : vector<512x128xf32>
    %c0_2 = arith.constant 0 : index
    %c0_3 = arith.constant 0 : index
    %9 = vector.load %arg2[%c0_2, %c0_3] : memref<512x128xf32, #tpu.memory_space<vmem>>, vector<512x128xf32>
    tpu.vector_store %arg2[%c0_2, %c0_3], %8 {strides = array<i32>} : memref<512x128xf32, #tpu.memory_space<vmem>>, vector<512x128xf32>,
    %c0_4 = arith.constant 0 : index
    %c0_5 = arith.constant 0 : index
    %10 = vector.load %arg3[%c0_4, %c0_5] : memref<512x128xf32, #tpu.memory_space<vmem>>, vector<512x128xf32>
    tpu.vector_store %arg3[%c0_4, %c0_5], %8 {strides = array<i32>} : memref<512x128xf32, #tpu.memory_space<vmem>>, vector<512x128xf32>,
    return
  }
  func.func @transform_0(%arg0: i32) -> (i32, i32) {
    %c0_i32 = arith.constant 0 : i32
    %c0_i32_0 = arith.constant 0 : i32
    return %arg0, %c0_i32 : i32, i32
  }
  func.func @transform_1(%arg0: i32) -> (i32, i32) {
    %c0_i32 = arith.constant 0 : i32
    %c0_i32_0 = arith.constant 0 : i32
    return %arg0, %c0_i32 : i32, i32
  }
  func.func @transform_2(%arg0: i32) -> (i32, i32) {
    %c0_i32 = arith.constant 0 : i32
    %c0_i32_0 = arith.constant 0 : i32
    return %arg0, %c0_i32 : i32, i32
  }
}

</mosaic_0001>

<bundles_post_ra>
// kernel: tpu_custom_call.1
= control target key start
LH: loop header
LB: loop body
LE: loop exit
PB: predicated region body
PF: predicated region fallthrough
CT: control target
= control target key end

     0   :  { %8 = vsyncpa [#allocation3], 0  ;;  %s1192_s0 = inlined_call_operand.hbm [shape: f32[512,128], index: 0, kind: input, shape index: {}]   ;;  %s1193_s1 = inlined_call_operand.hbm [shape: f32[512,128], index: 1, kind: output, shape index: {0}]   ;;  %s1194_s2 = inlined_call_operand.hbm [shape: f32[512,128], index: 2, kind: output, shape index: {1}]  }
   0x1   :  { %9 = vsyncpa [#allocation4], 0 }
   0x2   :  { %10 = vsyncpa [#allocation7], 0  ;;  %s834_s9 = smov [#allocation2]  }
   0x3   :  { %s16_s10 = sshll.u32 %s834_s9, 4  ;;  %s17_s10 = int_to_ptr.vmem [resolvable:$true] %s16_s10 }
   0x4   :  { %s776_s11 = scalar_lea.vmem %s17_s10, 8192  ;;  %p781_p1 = scmp.lt.s32.totalorder %s17_s10, %s17_s10 }
   0x5   :  { %p777_p0 = scmp.ne.s32.totalorder %s17_s10, %s776_s11  ;;  %p782_p2 = scmp.lt.s32.totalorder %s776_s11, %s776_s11 }
   0x7   :  { %p783_p3 = por %p782_p2, %p781_p1 }
   0x9   :  { %p784_p4 = pnand %p783_p3, %p777_p0 }
   0xb   :  { %787 = shalt.err (!%p784_p4)
}
   0xc   :  { %s835_s12 = smov 128   ;;  %s836_s13 = smov 8  }
   0xd   :  { %22 = dma.hbm_to_vmem [thread:$0]  %s1192_s0, 8192, %s17_s10, [#allocation3], %s835_s12, %s835_s12, %s836_s13  }
   0xe   :  { %828 = dma.done.wait [#allocation3], 8192  }
   0xf   :  { %829 = vsyncadd [#allocation3], 4294959104  ;;  %v860_v0 = vld [vmem:[#allocation2 + $0x10] sm:$0xff]  ;;  %v862_v1 = vld [vmem:[#allocation2] sm:$0xff]  ;;  %s837_s0 = smov [#allocation5]   ;;  %s838_s17 = smov [#allocation6]  }
  0x10   :  { %v864_v2 = vld [vmem:[#allocation2 + $0x18] sm:$0xff]  ;;  %v92_v3 = vmul.f32 %v860_v0, %v860_v0  ;;  %v90_v4 = vmul.f32 %v862_v1, %v862_v1  ;;  %v870_v5 = vld [vmem:[#allocation2 + $0x8] sm:$0xff]  ;;  %v878_v9 = vld [vmem:[#allocation2 + $0x20] sm:$0xff]  ;;  %s607_s16 = sshll.u32 %s837_s0, 4  ;;  %s619_s18 = sshll.u32 %s838_s17, 4  ;;  %s608_s16 = int_to_ptr.vmem [resolvable:$true] %s607_s16  ;;  %s620_s18 = int_to_ptr.vmem [resolvable:$true] %s619_s18 }
  0x11   :  { %v93_v6 = vmul.f32 %v864_v2, %v864_v2  ;;  %v91_v7 = vmul.f32 %v870_v5, %v870_v5  ;;  %v876_v8 = vld [vmem:[#allocation2 + $0x28] sm:$0xff]  ;;  %v94_v11 = vmul.f32 %v878_v9, %v878_v9  ;;  %v884_v12 = vld [vmem:[#allocation2 + $0x38] sm:$0xff]  ;;  %v886_v13 = vld [vmem:[#allocation2 + $0x30] sm:$0xff]  ;;  %s788_s19 = scalar_lea.vmem %s608_s16, 8192  ;;  %p793_p6 = scmp.lt.s32.totalorder %s608_s16, %s608_s16 }
  0x12   :  { %158 = vadd.xlane.f32.xlu1 %v92_v3  ;;  %154 = vadd.xlane.f32.xlu0 %v90_v4  ;;  %v95_v10 = vmul.f32 %v876_v8, %v876_v8  ;;  %v97_v14 = vmul.f32 %v884_v12, %v884_v12  ;;  %v96_v15 = vmul.f32 %v886_v13, %v886_v13  ;;  %v892_v16 = vld [vmem:[#allocation2 + $0x48] sm:$0xff]  ;;  %v894_v17 = vld [vmem:[#allocation2 + $0x40] sm:$0xff]  ;;  %v900_v20 = vld [vmem:[#allocation2 + $0x58] sm:$0xff]  ;;  %p789_p5 = scmp.ne.s32.totalorder %s608_s16, %s788_s19  ;;  %p794_p7 = scmp.lt.s32.totalorder %s788_s19, %s788_s19 }
  0x13   :  { %v99_v18 = vmul.f32 %v892_v16, %v892_v16  ;;  %v98_v19 = vmul.f32 %v894_v17, %v894_v17  ;;  %v902_v21 = vld [vmem:[#allocation2 + $0x50] sm:$0xff]  ;;  %v101_v22 = vmul.f32 %v900_v20, %v900_v20  ;;  %v908_v24 = vld [vmem:[#allocation2 + $0x68] sm:$0xff]  ;;  %v910_v25 = vld [vmem:[#allocation2 + $0x60] sm:$0xff] }
  0x14   :  { %v100_v23 = vmul.f32 %v902_v21, %v902_v21  ;;  %v103_v26 = vmul.f32 %v908_v24, %v908_v24  ;;  %v102_v27 = vmul.f32 %v910_v25, %v910_v25  ;;  %v916_v28 = vld [vmem:[#allocation2 + $0x78] sm:$0xff]  ;;  %v918_v29 = vld [vmem:[#allocation2 + $0x70] sm:$0xff]  ;;  %v924_v32 = vld [vmem:[#allocation2 + $0x88] sm:$0xff]  ;;  %p795_p8 = por %p794_p7, %p793_p6 }
  0x15   :  { %v105_v30 = vmul.f32 %v916_v28, %v916_v28  ;;  %v104_v31 = vmul.f32 %v918_v29, %v918_v29  ;;  %v926_v33 = vld [vmem:[#allocation2 + $0x80] sm:$0xff]  ;;  %v107_v34 = vmul.f32 %v924_v32, %v924_v32  ;;  %v932_v36 = vld [vmem:[#allocation2 + $0x98] sm:$0xff]  ;;  %v934_v37 = vld [vmem:[#allocation2 + $0x90] sm:$0xff] }
  0x16   :  { %160 = vadd.xlane.f32.xlu1 %v93_v6  ;;  %156 = vadd.xlane.f32.xlu0 %v91_v7  ;;  %v106_v35 = vmul.f32 %v926_v33, %v926_v33  ;;  %v109_v38 = vmul.f32 %v932_v36, %v932_v36  ;;  %v108_v39 = vmul.f32 %v934_v37, %v934_v37  ;;  %v940_v40 = vld [vmem:[#allocation2 + $0xa8] sm:$0xff]  ;;  %v942_v41 = vld [vmem:[#allocation2 + $0xa0] sm:$0xff]  ;;  %v948_v44 = vld [vmem:[#allocation2 + $0xb8] sm:$0xff]  ;;  %p796_p9 = pnand %p795_p8, %p789_p5 }
  0x17   :  { %v111_v42 = vmul.f32 %v940_v40, %v940_v40  ;;  %v110_v43 = vmul.f32 %v942_v41, %v942_v41  ;;  %v950_v45 = vld [vmem:[#allocation2 + $0xb0] sm:$0xff]  ;;  %v113_v46 = vmul.f32 %v948_v44, %v948_v44  ;;  %v956_v48 = vld [vmem:[#allocation2 + $0xc8] sm:$0xff]  ;;  %v958_v49 = vld [vmem:[#allocation2 + $0xc0] sm:$0xff] }
  0x18   :  { %v112_v47 = vmul.f32 %v950_v45, %v950_v45  ;;  %v115_v50 = vmul.f32 %v956_v48, %v956_v48  ;;  %v114_v51 = vmul.f32 %v958_v49, %v958_v49  ;;  %v964_v52 = vld [vmem:[#allocation2 + $0xd8] sm:$0xff]  ;;  %v966_v53 = vld [vmem:[#allocation2 + $0xd0] sm:$0xff]  ;;  %v972_v56 = vld [vmem:[#allocation2 + $0xe8] sm:$0xff] }
  0x19   :  { %v117_v54 = vmul.f32 %v964_v52, %v964_v52  ;;  %v116_v55 = vmul.f32 %v966_v53, %v966_v53  ;;  %v974_v57 = vld [vmem:[#allocation2 + $0xe0] sm:$0xff]  ;;  %v119_v58 = vmul.f32 %v972_v56, %v972_v56  ;;  %v980_v60 = vld [vmem:[#allocation2 + $0xf8] sm:$0xff]  ;;  %v982_v61 = vld [vmem:[#allocation2 + $0xf0] sm:$0xff] }
  0x1a   :  { %164 = vadd.xlane.f32.xlu1 %v95_v10  ;;  %162 = vadd.xlane.f32.xlu0 %v94_v11  ;;  %v118_v59 = vmul.f32 %v974_v57, %v974_v57  ;;  %v121_v62 = vmul.f32 %v980_v60, %v980_v60  ;;  %v120_v63 = vmul.f32 %v982_v61, %v982_v61  ;;  %v988_v3 = vld [vmem:[#allocation2 + $0x108] sm:$0xff]  ;;  %v990_v4 = vld [vmem:[#allocation2 + $0x100] sm:$0xff]  ;;  %v996_v10 = vld [vmem:[#allocation2 + $0x118] sm:$0xff] }
  0x1b   :  { %v123_v6 = vmul.f32 %v988_v3, %v988_v3  ;;  %v122_v7 = vmul.f32 %v990_v4, %v990_v4  ;;  %v998_v11 = vld [vmem:[#allocation2 + $0x110] sm:$0xff] }
  0x1e   :  { %168 = vadd.xlane.f32.xlu1 %v97_v14  ;;  %166 = vadd.xlane.f32.xlu0 %v96_v15  ;;  %v125_v14 = vmul.f32 %v996_v10, %v996_v10  ;;  %v124_v15 = vmul.f32 %v998_v11, %v998_v11 }
  0x22   :  { %172 = vadd.xlane.f32.xlu1 %v99_v18  ;;  %170 = vadd.xlane.f32.xlu0 %v98_v19  ;;  %v1004_v18 = vld [vmem:[#allocation2 + $0x128] sm:$0xff]  ;;  %v1006_v19 = vld [vmem:[#allocation2 + $0x120] sm:$0xff] }
  0x26   :  { %176 = vadd.xlane.f32.xlu1 %v101_v22  ;;  %174 = vadd.xlane.f32.xlu0 %v100_v23  ;;  %v127_v22 = vmul.f32 %v1004_v18, %v1004_v18  ;;  %v126_v23 = vmul.f32 %v1006_v19, %v1006_v19 }
  0x2a   :  { %180 = vadd.xlane.f32.xlu1 %v103_v26  ;;  %178 = vadd.xlane.f32.xlu0 %v102_v27  ;;  %v1012_v26 = vld [vmem:[#allocation2 + $0x138] sm:$0xff]  ;;  %v1014_v27 = vld [vmem:[#allocation2 + $0x130] sm:$0xff] }
  0x2e   :  { %184 = vadd.xlane.f32.xlu1 %v105_v30  ;;  %182 = vadd.xlane.f32.xlu0 %v104_v31  ;;  %v129_v30 = vmul.f32 %v1012_v26, %v1012_v26  ;;  %v128_v31 = vmul.f32 %v1014_v27, %v1014_v27 }
  0x32   :  { %188 = vadd.xlane.f32.xlu1 %v107_v34  ;;  %186 = vadd.xlane.f32.xlu0 %v106_v35  ;;  %v1020_v34 = vld [vmem:[#allocation2 + $0x148] sm:$0xff]  ;;  %v1022_v35 = vld [vmem:[#allocation2 + $0x140] sm:$0xff] }
  0x36   :  { %192 = vadd.xlane.f32.xlu1 %v109_v38  ;;  %190 = vadd.xlane.f32.xlu0 %v108_v39  ;;  %v131_v38 = vmul.f32 %v1020_v34, %v1020_v34  ;;  %v130_v39 = vmul.f32 %v1022_v35, %v1022_v35 }
  0x3a   :  { %196 = vadd.xlane.f32.xlu1 %v111_v42  ;;  %194 = vadd.xlane.f32.xlu0 %v110_v43  ;;  %v1028_v42 = vld [vmem:[#allocation2 + $0x158] sm:$0xff]  ;;  %v1030_v43 = vld [vmem:[#allocation2 + $0x150] sm:$0xff] }
  0x3e   :  { %200 = vadd.xlane.f32.xlu1 %v113_v46  ;;  %198 = vadd.xlane.f32.xlu0 %v112_v47  ;;  %v133_v46 = vmul.f32 %v1028_v42, %v1028_v42  ;;  %v132_v47 = vmul.f32 %v1030_v43, %v1030_v43 }
  0x42   :  { %204 = vadd.xlane.f32.xlu1 %v115_v50  ;;  %202 = vadd.xlane.f32.xlu0 %v114_v51  ;;  %v1036_v50 = vld [vmem:[#allocation2 + $0x168] sm:$0xff]  ;;  %v1038_v51 = vld [vmem:[#allocation2 + $0x160] sm:$0xff] }
  0x46   :  { %208 = vadd.xlane.f32.xlu1 %v117_v54  ;;  %206 = vadd.xlane.f32.xlu0 %v116_v55  ;;  %v135_v54 = vmul.f32 %v1036_v50, %v1036_v50  ;;  %v134_v55 = vmul.f32 %v1038_v51, %v1038_v51 }
  0x4a   :  { %212 = vadd.xlane.f32.xlu1 %v119_v58  ;;  %210 = vadd.xlane.f32.xlu0 %v118_v59  ;;  %v1044_v58 = vld [vmem:[#allocation2 + $0x178] sm:$0xff]  ;;  %v1046_v59 = vld [vmem:[#allocation2 + $0x170] sm:$0xff] }
  0x4e   :  { %216 = vadd.xlane.f32.xlu1 %v121_v62  ;;  %214 = vadd.xlane.f32.xlu0 %v120_v63  ;;  %v137_v62 = vmul.f32 %v1044_v58, %v1044_v58  ;;  %v136_v63 = vmul.f32 %v1046_v59, %v1046_v59 }
  0x52   :  { %220 = vadd.xlane.f32.xlu1 %v123_v6  ;;  %218 = vadd.xlane.f32.xlu0 %v122_v7  ;;  %v1052_v6 = vld [vmem:[#allocation2 + $0x188] sm:$0xff]  ;;  %v1054_v7 = vld [vmem:[#allocation2 + $0x180] sm:$0xff] }
  0x53   :  { %1211 = vst [vmem:[#allocation11_spill] sm:$0xff] %v1052_v6  ;;  %1212 = vst [vmem:[#allocation12_spill] sm:$0xff] %v1054_v7 }
  0x56   :  { %224 = vadd.xlane.f32.xlu1 %v125_v14  ;;  %222 = vadd.xlane.f32.xlu0 %v124_v15  ;;  %v139_v14 = vmul.f32 %v1052_v6, %v1052_v6  ;;  %v138_v15 = vmul.f32 %v1054_v7, %v1054_v7 }
  0x5a   :  { %228 = vadd.xlane.f32.xlu1 %v127_v22  ;;  %226 = vadd.xlane.f32.xlu0 %v126_v23  ;;  %v1060_v22 = vld [vmem:[#allocation2 + $0x198] sm:$0xff]  ;;  %v1062_v23 = vld [vmem:[#allocation2 + $0x190] sm:$0xff] }
  0x5b   :  { %1213 = vst [vmem:[#allocation13_spill] sm:$0xff] %v1060_v22  ;;  %1214 = vst [vmem:[#allocation14_spill] sm:$0xff] %v1062_v23 }
  0x5e   :  { %232 = vadd.xlane.f32.xlu1 %v129_v30  ;;  %230 = vadd.xlane.f32.xlu0 %v128_v31  ;;  %v141_v30 = vmul.f32 %v1060_v22, %v1060_v22  ;;  %v140_v31 = vmul.f32 %v1062_v23, %v1062_v23 }
  0x62   :  { %236 = vadd.xlane.f32.xlu1 %v131_v38  ;;  %234 = vadd.xlane.f32.xlu0 %v130_v39  ;;  %v1068_v38 = vld [vmem:[#allocation2 + $0x1a8] sm:$0xff]  ;;  %v1070_v39 = vld [vmem:[#allocation2 + $0x1a0] sm:$0xff] }
  0x63   :  { %1215 = vst [vmem:[#allocation15_spill] sm:$0xff] %v1068_v38  ;;  %1216 = vst [vmem:[#allocation16_spill] sm:$0xff] %v1070_v39 }
  0x66   :  { %240 = vadd.xlane.f32.xlu1 %v133_v46  ;;  %238 = vadd.xlane.f32.xlu0 %v132_v47  ;;  %v143_v46 = vmul.f32 %v1068_v38, %v1068_v38  ;;  %v142_v47 = vmul.f32 %v1070_v39, %v1070_v39 }
  0x6a   :  { %244 = vadd.xlane.f32.xlu1 %v135_v54  ;;  %242 = vadd.xlane.f32.xlu0 %v134_v55  ;;  %v1076_v54 = vld [vmem:[#allocation2 + $0x1b8] sm:$0xff]  ;;  %v1078_v55 = vld [vmem:[#allocation2 + $0x1b0] sm:$0xff] }
  0x6b   :  { %1217 = vst [vmem:[#allocation17_spill] sm:$0xff] %v1076_v54  ;;  %1218 = vst [vmem:[#allocation18_spill] sm:$0xff] %v1078_v55 }
  0x6e   :  { %248 = vadd.xlane.f32.xlu1 %v137_v62  ;;  %246 = vadd.xlane.f32.xlu0 %v136_v63  ;;  %v145_v62 = vmul.f32 %v1076_v54, %v1076_v54  ;;  %v144_v63 = vmul.f32 %v1078_v55, %v1078_v55 }
  0x72   :  { %252 = vadd.xlane.f32.xlu1 %v139_v14  ;;  %250 = vadd.xlane.f32.xlu0 %v138_v15  ;;  %v1084_v14 = vld [vmem:[#allocation2 + $0x1c8] sm:$0xff]  ;;  %v1086_v15 = vld [vmem:[#allocation2 + $0x1c0] sm:$0xff] }
  0x73   :  { %1219 = vst [vmem:[#allocation19_spill] sm:$0xff] %v1084_v14  ;;  %1220 = vst [vmem:[#allocation20_spill] sm:$0xff] %v1086_v15 }
  0x76   :  { %256 = vadd.xlane.f32.xlu1 %v141_v30  ;;  %254 = vadd.xlane.f32.xlu0 %v140_v31  ;;  %v147_v30 = vmul.f32 %v1084_v14, %v1084_v14  ;;  %v146_v31 = vmul.f32 %v1086_v15, %v1086_v15 }
  0x7a   :  { %260 = vadd.xlane.f32.xlu1 %v143_v46  ;;  %258 = vadd.xlane.f32.xlu0 %v142_v47  ;;  %v1092_v46 = vld [vmem:[#allocation2 + $0x1d8] sm:$0xff]  ;;  %v1094_v47 = vld [vmem:[#allocation2 + $0x1d0] sm:$0xff] }
  0x7b   :  { %1221 = vst [vmem:[#allocation21_spill] sm:$0xff] %v1092_v46  ;;  %1222 = vst [vmem:[#allocation22_spill] sm:$0xff] %v1094_v47  ;;  %v149_v55 = vmul.f32 %v1092_v46, %v1092_v46  ;;  %v148_v54 = vmul.f32 %v1094_v47, %v1094_v47 }
  0x7e   :  { %264 = vadd.xlane.f32.xlu1 %v145_v62  ;;  %262 = vadd.xlane.f32.xlu0 %v144_v63  ;;  %v1100_v62 = vld [vmem:[#allocation2 + $0x1e8] sm:$0xff]  ;;  %v1102_v63 = vld [vmem:[#allocation2 + $0x1e0] sm:$0xff] }
  0x7f   :  { %1223 = vst [vmem:[#allocation23_spill] sm:$0xff] %v1100_v62  ;;  %1224 = vst [vmem:[#allocation24_spill] sm:$0xff] %v1102_v63  ;;  %v151_v15 = vmul.f32 %v1100_v62, %v1100_v62  ;;  %v150_v14 = vmul.f32 %v1102_v63, %v1102_v63 }
  0x82   :  { %268 = vadd.xlane.f32.xlu1 %v147_v30  ;;  %266 = vadd.xlane.f32.xlu0 %v146_v31  ;;  %v1108_v30 = vld [vmem:[#allocation2 + $0x1f8] sm:$0xff]  ;;  %v1110_v31 = vld [vmem:[#allocation2 + $0x1f0] sm:$0xff] }
  0x83   :  { %1225 = vst [vmem:[#allocation25_spill] sm:$0xff] %v1108_v30  ;;  %1226 = vst [vmem:[#allocation26_spill] sm:$0xff] %v1110_v31  ;;  %v153_v47 = vmul.f32 %v1108_v30, %v1108_v30  ;;  %v152_v46 = vmul.f32 %v1110_v31, %v1110_v31 }
  0x86   :  { %272 = vadd.xlane.f32.xlu1 %v149_v55  ;;  %270 = vadd.xlane.f32.xlu0 %v148_v54 }
  0x8a   :  { %276 = vadd.xlane.f32.xlu1 %v151_v15  ;;  %274 = vadd.xlane.f32.xlu0 %v150_v14 }
  0x8e   :  { %280 = vadd.xlane.f32.xlu1 %v153_v47  ;;  %278 = vadd.xlane.f32.xlu0 %v152_v46 }
  0x9b   :  { %v159_v54 = vpop.xlane.xlu1 %158  ;;  %v155_v55 = vpop.xlane.xlu0 %154 }
  0x9c   :  { %v284_v62 = vmax.f32 %v159_v54, 1e-24  ;;  %v282_v39 = vmax.f32 %v155_v55, 1e-24 }
  0x9e   :  { %640 = vrsqrt.f32 %v284_v62 }
  0x9f   :  { %642 = vrsqrt.f32 %v282_v39  ;;  %v161_v63 = vpop.xlane.xlu1 %160  ;;  %v157_v38 = vpop.xlane.xlu0 %156 }
  0xa0   :  { %v285_v23 = vmax.f32 %v161_v63, 1e-24  ;;  %v283_v22 = vmax.f32 %v157_v38, 1e-24 }
  0xa2   :  { %644 = vrsqrt.f32 %v285_v23 }
  0xa3   :  { %646 = vrsqrt.f32 %v283_v22  ;;  %v165_v14 = vpop.xlane.xlu1 %164  ;;  %v163_v15 = vpop.xlane.xlu0 %162 }
  0xa4   :  { %v287_v30 = vmax.f32 %v165_v14, 1e-24  ;;  %v286_v7 = vmax.f32 %v163_v15, 1e-24 }
  0xa6   :  { %648 = vrsqrt.f32 %v287_v30 }
  0xa7   :  { %650 = vrsqrt.f32 %v286_v7  ;;  %v169_v47 = vpop.xlane.xlu1 %168  ;;  %v167_v46 = vpop.xlane.xlu0 %166 }
  0xa8   :  { %v289_v31 = vmax.f32 %v169_v47, 1e-24  ;;  %v288_v6 = vmax.f32 %v167_v46, 1e-24 }
  0xaa   :  { %652 = vrsqrt.f32 %v289_v31 }
  0xab   :  { %v641_v54 = vpop.eup %640  ;;  %654 = vrsqrt.f32 %v288_v6  ;;  %v173_v39 = vpop.xlane.xlu1 %172 }
  0xac   :  { %v171_v62 = vpop.xlane.xlu0 %170  ;;  %v643_v55 = vpop.eup %642  ;;  %v412_v38 = vmul.f32 %v641_v54, %v860_v0  ;;  %v291_v23 = vmax.f32 %v173_v39, 1e-24 }
  0xad   :  { %v290_v22 = vmax.f32 %v171_v62, 1e-24  ;;  %v410_v63 = vmul.f32 %v643_v55, %v862_v1 }
  0xae   :  { %476 = vst [vmem:[#allocation5 + $0x10] sm:$0xff] %v412_v38  ;;  %540 = vst [vmem:[#allocation6 + $0x10] sm:$0xff] %v412_v38  ;;  %656 = vrsqrt.f32 %v291_v23 }
  0xaf   :  { %v645_v7 = vpop.eup %644  ;;  %474 = vst [vmem:[#allocation5] sm:$0xff] %v410_v63  ;;  %538 = vst [vmem:[#allocation6] sm:$0xff] %v410_v63  ;;  %658 = vrsqrt.f32 %v290_v22  ;;  %v177_v30 = vpop.xlane.xlu1 %176 }
  0xb0   :  { %v175_v31 = vpop.xlane.xlu0 %174  ;;  %v647_v14 = vpop.eup %646  ;;  %v413_v6 = vmul.f32 %v645_v7, %v864_v2  ;;  %v293_v15 = vmax.f32 %v177_v30, 1e-24 }
  0xb1   :  { %v292_v47 = vmax.f32 %v175_v31, 1e-24  ;;  %v411_v0 = vmul.f32 %v647_v14, %v870_v5 }
  0xb2   :  { %477 = vst [vmem:[#allocation5 + $0x18] sm:$0xff] %v413_v6  ;;  %541 = vst [vmem:[#allocation6 + $0x18] sm:$0xff] %v413_v6  ;;  %660 = vrsqrt.f32 %v293_v15 }
  0xb3   :  { %v649_v1 = vpop.eup %648  ;;  %475 = vst [vmem:[#allocation5 + $0x8] sm:$0xff] %v411_v0  ;;  %539 = vst [vmem:[#allocation6 + $0x8] sm:$0xff] %v411_v0  ;;  %662 = vrsqrt.f32 %v292_v47  ;;  %v181_v46 = vpop.xlane.xlu1 %180 }
  0xb4   :  { %v179_v54 = vpop.xlane.xlu0 %178  ;;  %v651_v39 = vpop.eup %650  ;;  %v415_v62 = vmul.f32 %v649_v1, %v876_v8  ;;  %v295_v55 = vmax.f32 %v181_v46, 1e-24 }
  0xb5   :  { %v294_v38 = vmax.f32 %v179_v54, 1e-24  ;;  %v414_v2 = vmul.f32 %v651_v39, %v878_v9 }
  0xb6   :  { %479 = vst [vmem:[#allocation5 + $0x28] sm:$0xff] %v415_v62  ;;  %543 = vst [vmem:[#allocation6 + $0x28] sm:$0xff] %v415_v62  ;;  %664 = vrsqrt.f32 %v295_v55 }
  0xb7   :  { %v653_v5 = vpop.eup %652  ;;  %478 = vst [vmem:[#allocation5 + $0x20] sm:$0xff] %v414_v2  ;;  %542 = vst [vmem:[#allocation6 + $0x20] sm:$0xff] %v414_v2  ;;  %666 = vrsqrt.f32 %v294_v38  ;;  %v185_v23 = vpop.xlane.xlu1 %184 }
  0xb8   :  { %v183_v22 = vpop.xlane.xlu0 %182  ;;  %v655_v63 = vpop.eup %654  ;;  %v417_v7 = vmul.f32 %v653_v5, %v884_v12  ;;  %v297_v30 = vmax.f32 %v185_v23, 1e-24 }
  0xb9   :  { %v296_v31 = vmax.f32 %v183_v22, 1e-24  ;;  %v416_v8 = vmul.f32 %v655_v63, %v886_v13 }
  0xba   :  { %481 = vst [vmem:[#allocation5 + $0x38] sm:$0xff] %v417_v7  ;;  %545 = vst [vmem:[#allocation6 + $0x38] sm:$0xff] %v417_v7  ;;  %668 = vrsqrt.f32 %v297_v30 }
  0xbb   :  { %v657_v9 = vpop.eup %656  ;;  %480 = vst [vmem:[#allocation5 + $0x30] sm:$0xff] %v416_v8  ;;  %544 = vst [vmem:[#allocation6 + $0x30] sm:$0xff] %v416_v8  ;;  %670 = vrsqrt.f32 %v296_v31  ;;  %v189_v14 = vpop.xlane.xlu1 %188 }
  0xbc   :  { %v187_v6 = vpop.xlane.xlu0 %186  ;;  %v659_v15 = vpop.eup %658  ;;  %v419_v47 = vmul.f32 %v657_v9, %v892_v16  ;;  %v299_v0 = vmax.f32 %v189_v14, 1e-24 }
  0xbd   :  { %v298_v1 = vmax.f32 %v187_v6, 1e-24  ;;  %v418_v12 = vmul.f32 %v659_v15, %v894_v17 }
  0xbe   :  { %483 = vst [vmem:[#allocation5 + $0x48] sm:$0xff] %v419_v47  ;;  %547 = vst [vmem:[#allocation6 + $0x48] sm:$0xff] %v419_v47  ;;  %672 = vrsqrt.f32 %v299_v0 }
  0xbf   :  { %v661_v13 = vpop.eup %660  ;;  %482 = vst [vmem:[#allocation5 + $0x40] sm:$0xff] %v418_v12  ;;  %546 = vst [vmem:[#allocation6 + $0x40] sm:$0xff] %v418_v12  ;;  %674 = vrsqrt.f32 %v298_v1  ;;  %v193_v46 = vpop.xlane.xlu1 %192 }
  0xc0   :  { %v191_v54 = vpop.xlane.xlu0 %190  ;;  %v663_v39 = vpop.eup %662  ;;  %v421_v62 = vmul.f32 %v661_v13, %v900_v20  ;;  %v301_v55 = vmax.f32 %v193_v46, 1e-24 }
  0xc1   :  { %v300_v38 = vmax.f32 %v191_v54, 1e-24  ;;  %v420_v16 = vmul.f32 %v663_v39, %v902_v21 }
  0xc2   :  { %485 = vst [vmem:[#allocation5 + $0x58] sm:$0xff] %v421_v62  ;;  %549 = vst [vmem:[#allocation6 + $0x58] sm:$0xff] %v421_v62  ;;  %676 = vrsqrt.f32 %v301_v55 }
  0xc3   :  { %v665_v17 = vpop.eup %664  ;;  %484 = vst [vmem:[#allocation5 + $0x50] sm:$0xff] %v420_v16  ;;  %548 = vst [vmem:[#allocation6 + $0x50] sm:$0xff] %v420_v16  ;;  %678 = vrsqrt.f32 %v300_v38  ;;  %v197_v2 = vpop.xlane.xlu1 %196 }
  0xc4   :  { %v195_v5 = vpop.xlane.xlu0 %194  ;;  %v667_v23 = vpop.eup %666  ;;  %v423_v22 = vmul.f32 %v665_v17, %v908_v24  ;;  %v303_v63 = vmax.f32 %v197_v2, 1e-24 }
  0xc5   :  { %v302_v7 = vmax.f32 %v195_v5, 1e-24  ;;  %v422_v20 = vmul.f32 %v667_v23, %v910_v25 }
  0xc6   :  { %487 = vst [vmem:[#allocation5 + $0x68] sm:$0xff] %v423_v22  ;;  %551 = vst [vmem:[#allocation6 + $0x68] sm:$0xff] %v423_v22  ;;  %680 = vrsqrt.f32 %v303_v63 }
  0xc7   :  { %v669_v21 = vpop.eup %668  ;;  %486 = vst [vmem:[#allocation5 + $0x60] sm:$0xff] %v422_v20  ;;  %550 = vst [vmem:[#allocation6 + $0x60] sm:$0xff] %v422_v20  ;;  %682 = vrsqrt.f32 %v302_v7  ;;  %v201_v30 = vpop.xlane.xlu1 %200 }
  0xc8   :  { %v199_v31 = vpop.xlane.xlu0 %198  ;;  %v671_v8 = vpop.eup %670  ;;  %v425_v9 = vmul.f32 %v669_v21, %v916_v28  ;;  %v305_v14 = vmax.f32 %v201_v30, 1e-24 }
  0xc9   :  { %v304_v6 = vmax.f32 %v199_v31, 1e-24  ;;  %v424_v24 = vmul.f32 %v671_v8, %v918_v29 }
  0xca   :  { %489 = vst [vmem:[#allocation5 + $0x78] sm:$0xff] %v425_v9  ;;  %553 = vst [vmem:[#allocation6 + $0x78] sm:$0xff] %v425_v9  ;;  %684 = vrsqrt.f32 %v305_v14 }
  0xcb   :  { %v673_v25 = vpop.eup %672  ;;  %488 = vst [vmem:[#allocation5 + $0x70] sm:$0xff] %v424_v24  ;;  %552 = vst [vmem:[#allocation6 + $0x70] sm:$0xff] %v424_v24  ;;  %686 = vrsqrt.f32 %v304_v6  ;;  %v205_v15 = vpop.xlane.xlu1 %204 }
  0xcc   :  { %v203_v47 = vpop.xlane.xlu0 %202  ;;  %v675_v0 = vpop.eup %674  ;;  %v427_v1 = vmul.f32 %v673_v25, %v924_v32  ;;  %v307_v12 = vmax.f32 %v205_v15, 1e-24 }
  0xcd   :  { %v306_v13 = vmax.f32 %v203_v47, 1e-24  ;;  %v426_v28 = vmul.f32 %v675_v0, %v926_v33 }
  0xce   :  { %491 = vst [vmem:[#allocation5 + $0x88] sm:$0xff] %v427_v1  ;;  %555 = vst [vmem:[#allocation6 + $0x88] sm:$0xff] %v427_v1  ;;  %688 = vrsqrt.f32 %v307_v12 }
  0xcf   :  { %v677_v29 = vpop.eup %676  ;;  %490 = vst [vmem:[#allocation5 + $0x80] sm:$0xff] %v426_v28  ;;  %554 = vst [vmem:[#allocation6 + $0x80] sm:$0xff] %v426_v28  ;;  %690 = vrsqrt.f32 %v306_v13  ;;  %v209_v46 = vpop.xlane.xlu1 %208 }
  0xd0   :  { %v207_v54 = vpop.xlane.xlu0 %206  ;;  %v679_v39 = vpop.eup %678  ;;  %v429_v62 = vmul.f32 %v677_v29, %v932_v36  ;;  %v309_v55 = vmax.f32 %v209_v46, 1e-24 }
  0xd1   :  { %v308_v38 = vmax.f32 %v207_v54, 1e-24  ;;  %v428_v32 = vmul.f32 %v679_v39, %v934_v37 }
  0xd2   :  { %493 = vst [vmem:[#allocation5 + $0x98] sm:$0xff] %v429_v62  ;;  %557 = vst [vmem:[#allocation6 + $0x98] sm:$0xff] %v429_v62  ;;  %692 = vrsqrt.f32 %v309_v55 }
  0xd3   :  { %v681_v33 = vpop.eup %680  ;;  %492 = vst [vmem:[#allocation5 + $0x90] sm:$0xff] %v428_v32  ;;  %556 = vst [vmem:[#allocation6 + $0x90] sm:$0xff] %v428_v32  ;;  %694 = vrsqrt.f32 %v308_v38  ;;  %v213_v16 = vpop.xlane.xlu1 %212 }
  0xd4   :  { %v211_v17 = vpop.xlane.xlu0 %210  ;;  %v683_v2 = vpop.eup %682  ;;  %v431_v5 = vmul.f32 %v681_v33, %v940_v40  ;;  %v311_v23 = vmax.f32 %v213_v16, 1e-24 }
  0xd5   :  { %v310_v22 = vmax.f32 %v211_v17, 1e-24  ;;  %v430_v36 = vmul.f32 %v683_v2, %v942_v41 }
  0xd6   :  { %495 = vst [vmem:[#allocation5 + $0xa8] sm:$0xff] %v431_v5  ;;  %559 = vst [vmem:[#allocation6 + $0xa8] sm:$0xff] %v431_v5  ;;  %696 = vrsqrt.f32 %v311_v23 }
  0xd7   :  { %v685_v37 = vpop.eup %684  ;;  %494 = vst [vmem:[#allocation5 + $0xa0] sm:$0xff] %v430_v36  ;;  %558 = vst [vmem:[#allocation6 + $0xa0] sm:$0xff] %v430_v36  ;;  %698 = vrsqrt.f32 %v310_v22  ;;  %v217_v63 = vpop.xlane.xlu1 %216 }
  0xd8   :  { %v215_v7 = vpop.xlane.xlu0 %214  ;;  %v687_v20 = vpop.eup %686  ;;  %v433_v21 = vmul.f32 %v685_v37, %v948_v44  ;;  %v313_v30 = vmax.f32 %v217_v63, 1e-24 }
  0xd9   :  { %v312_v31 = vmax.f32 %v215_v7, 1e-24  ;;  %v432_v40 = vmul.f32 %v687_v20, %v950_v45 }
  0xda   :  { %497 = vst [vmem:[#allocation5 + $0xb8] sm:$0xff] %v433_v21  ;;  %561 = vst [vmem:[#allocation6 + $0xb8] sm:$0xff] %v433_v21  ;;  %700 = vrsqrt.f32 %v313_v30 }
  0xdb   :  { %v689_v41 = vpop.eup %688  ;;  %496 = vst [vmem:[#allocation5 + $0xb0] sm:$0xff] %v432_v40  ;;  %560 = vst [vmem:[#allocation6 + $0xb0] sm:$0xff] %v432_v40  ;;  %702 = vrsqrt.f32 %v312_v31  ;;  %v221_v8 = vpop.xlane.xlu1 %220 }
  0xdc   :  { %v219_v9 = vpop.xlane.xlu0 %218  ;;  %v691_v14 = vpop.eup %690  ;;  %v435_v6 = vmul.f32 %v689_v41, %v956_v48  ;;  %v315_v24 = vmax.f32 %v221_v8, 1e-24 }
  0xdd   :  { %v314_v25 = vmax.f32 %v219_v9, 1e-24  ;;  %v434_v44 = vmul.f32 %v691_v14, %v958_v49 }
  0xde   :  { %499 = vst [vmem:[#allocation5 + $0xc8] sm:$0xff] %v435_v6  ;;  %563 = vst [vmem:[#allocation6 + $0xc8] sm:$0xff] %v435_v6  ;;  %704 = vrsqrt.f32 %v315_v24 }
  0xdf   :  { %v693_v45 = vpop.eup %692  ;;  %498 = vst [vmem:[#allocation5 + $0xc0] sm:$0xff] %v434_v44  ;;  %562 = vst [vmem:[#allocation6 + $0xc0] sm:$0xff] %v434_v44  ;;  %706 = vrsqrt.f32 %v314_v25  ;;  %v225_v15 = vpop.xlane.xlu1 %224 }
  0xe0   :  { %v223_v47 = vpop.xlane.xlu0 %222  ;;  %v695_v0 = vpop.eup %694  ;;  %v437_v1 = vmul.f32 %v693_v45, %v964_v52  ;;  %v317_v12 = vmax.f32 %v225_v15, 1e-24 }
  0xe1   :  { %v316_v13 = vmax.f32 %v223_v47, 1e-24  ;;  %v436_v48 = vmul.f32 %v695_v0, %v966_v53 }
  0xe2   :  { %501 = vst [vmem:[#allocation5 + $0xd8] sm:$0xff] %v437_v1  ;;  %565 = vst [vmem:[#allocation6 + $0xd8] sm:$0xff] %v437_v1  ;;  %708 = vrsqrt.f32 %v317_v12 }
  0xe3   :  { %v697_v49 = vpop.eup %696  ;;  %500 = vst [vmem:[#allocation5 + $0xd0] sm:$0xff] %v436_v48  ;;  %564 = vst [vmem:[#allocation6 + $0xd0] sm:$0xff] %v436_v48  ;;  %710 = vrsqrt.f32 %v316_v13  ;;  %v229_v28 = vpop.xlane.xlu1 %228 }
  0xe4   :  { %v227_v29 = vpop.xlane.xlu0 %226  ;;  %v699_v46 = vpop.eup %698  ;;  %v439_v54 = vmul.f32 %v697_v49, %v972_v56  ;;  %v319_v39 = vmax.f32 %v229_v28, 1e-24 }
  0xe5   :  { %v318_v62 = vmax.f32 %v227_v29, 1e-24  ;;  %v438_v52 = vmul.f32 %v699_v46, %v974_v57 }
  0xe6   :  { %503 = vst [vmem:[#allocation5 + $0xe8] sm:$0xff] %v439_v54  ;;  %567 = vst [vmem:[#allocation6 + $0xe8] sm:$0xff] %v439_v54  ;;  %712 = vrsqrt.f32 %v319_v39 }
  0xe7   :  { %v701_v53 = vpop.eup %700  ;;  %502 = vst [vmem:[#allocation5 + $0xe0] sm:$0xff] %v438_v52  ;;  %566 = vst [vmem:[#allocation6 + $0xe0] sm:$0xff] %v438_v52  ;;  %714 = vrsqrt.f32 %v318_v62  ;;  %v233_v55 = vpop.xlane.xlu1 %232 }
  0xe8   :  { %v231_v38 = vpop.xlane.xlu0 %230  ;;  %v703_v32 = vpop.eup %702  ;;  %v441_v33 = vmul.f32 %v701_v53, %v980_v60  ;;  %v321_v16 = vmax.f32 %v233_v55, 1e-24 }
  0xe9   :  { %v320_v17 = vmax.f32 %v231_v38, 1e-24  ;;  %v440_v56 = vmul.f32 %v703_v32, %v982_v61 }
  0xea   :  { %505 = vst [vmem:[#allocation5 + $0xf8] sm:$0xff] %v441_v33  ;;  %569 = vst [vmem:[#allocation6 + $0xf8] sm:$0xff] %v441_v33  ;;  %716 = vrsqrt.f32 %v321_v16 }
  0xeb   :  { %v705_v57 = vpop.eup %704  ;;  %504 = vst [vmem:[#allocation5 + $0xf0] sm:$0xff] %v440_v56  ;;  %568 = vst [vmem:[#allocation6 + $0xf0] sm:$0xff] %v440_v56  ;;  %718 = vrsqrt.f32 %v320_v17  ;;  %v237_v2 = vpop.xlane.xlu1 %236 }
  0xec   :  { %v235_v5 = vpop.xlane.xlu0 %234  ;;  %v707_v23 = vpop.eup %706  ;;  %v443_v22 = vmul.f32 %v705_v57, %v988_v3  ;;  %v323_v36 = vmax.f32 %v237_v2, 1e-24 }
  0xed   :  { %v322_v37 = vmax.f32 %v235_v5, 1e-24  ;;  %v442_v60 = vmul.f32 %v707_v23, %v990_v4 }
  0xee   :  { %507 = vst [vmem:[#allocation5 + $0x108] sm:$0xff] %v443_v22  ;;  %571 = vst [vmem:[#allocation6 + $0x108] sm:$0xff] %v443_v22  ;;  %720 = vrsqrt.f32 %v323_v36 }
  0xef   :  { %v709_v61 = vpop.eup %708  ;;  %506 = vst [vmem:[#allocation5 + $0x100] sm:$0xff] %v442_v60  ;;  %570 = vst [vmem:[#allocation6 + $0x100] sm:$0xff] %v442_v60  ;;  %722 = vrsqrt.f32 %v322_v37  ;;  %v241_v63 = vpop.xlane.xlu1 %240  ;;  %v1227_v37 = vld [vmem:[#allocation11_spill] sm:$0xff] }
  0xf0   :  { %v239_v7 = vpop.xlane.xlu0 %238  ;;  %v711_v20 = vpop.eup %710  ;;  %v445_v21 = vmul.f32 %v709_v61, %v996_v10  ;;  %v325_v30 = vmax.f32 %v241_v63, 1e-24 }
  0xf1   :  { %v324_v31 = vmax.f32 %v239_v7, 1e-24  ;;  %v444_v3 = vmul.f32 %v711_v20, %v998_v11  ;;  %v1228_v7 = vld [vmem:[#allocation12_spill] sm:$0xff] }
  0xf2   :  { %509 = vst [vmem:[#allocation5 + $0x118] sm:$0xff] %v445_v21  ;;  %573 = vst [vmem:[#allocation6 + $0x118] sm:$0xff] %v445_v21  ;;  %724 = vrsqrt.f32 %v325_v30 }
  0xf3   :  { %v713_v4 = vpop.eup %712  ;;  %508 = vst [vmem:[#allocation5 + $0x110] sm:$0xff] %v444_v3  ;;  %572 = vst [vmem:[#allocation6 + $0x110] sm:$0xff] %v444_v3  ;;  %726 = vrsqrt.f32 %v324_v31  ;;  %v245_v40 = vpop.xlane.xlu1 %244  ;;  %v1229_v31 = vld [vmem:[#allocation13_spill] sm:$0xff] }
  0xf4   :  { %v243_v41 = vpop.xlane.xlu0 %242  ;;  %v715_v8 = vpop.eup %714  ;;  %v447_v9 = vmul.f32 %v713_v4, %v1004_v18  ;;  %v327_v14 = vmax.f32 %v245_v40, 1e-24 }
  0xf5   :  { %v326_v6 = vmax.f32 %v243_v41, 1e-24  ;;  %v446_v10 = vmul.f32 %v715_v8, %v1006_v19  ;;  %v1230_v41 = vld [vmem:[#allocation14_spill] sm:$0xff] }
  0xf6   :  { %511 = vst [vmem:[#allocation5 + $0x128] sm:$0xff] %v447_v9  ;;  %575 = vst [vmem:[#allocation6 + $0x128] sm:$0xff] %v447_v9  ;;  %728 = vrsqrt.f32 %v327_v14 }
  0xf7   :  { %v717_v11 = vpop.eup %716  ;;  %510 = vst [vmem:[#allocation5 + $0x120] sm:$0xff] %v446_v10  ;;  %574 = vst [vmem:[#allocation6 + $0x120] sm:$0xff] %v446_v10  ;;  %730 = vrsqrt.f32 %v326_v6  ;;  %v249_v24 = vpop.xlane.xlu1 %248 }
  0xf8   :  { %v247_v25 = vpop.xlane.xlu0 %246  ;;  %v719_v44 = vpop.eup %718  ;;  %v449_v45 = vmul.f32 %v717_v11, %v1012_v26  ;;  %v329_v15 = vmax.f32 %v249_v24, 1e-24  ;;  %v1231_v11 = vld [vmem:[#allocation15_spill] sm:$0xff] }
  0xf9   :  { %v328_v47 = vmax.f32 %v247_v25, 1e-24  ;;  %v448_v18 = vmul.f32 %v719_v44, %v1014_v27 }
  0xfa   :  { %513 = vst [vmem:[#allocation5 + $0x138] sm:$0xff] %v449_v45  ;;  %577 = vst [vmem:[#allocation6 + $0x138] sm:$0xff] %v449_v45  ;;  %732 = vrsqrt.f32 %v329_v15  ;;  %v1232_v45 = vld [vmem:[#allocation16_spill] sm:$0xff] }
  0xfb   :  { %v721_v19 = vpop.eup %720  ;;  %512 = vst [vmem:[#allocation5 + $0x130] sm:$0xff] %v448_v18  ;;  %576 = vst [vmem:[#allocation6 + $0x130] sm:$0xff] %v448_v18  ;;  %734 = vrsqrt.f32 %v328_v47  ;;  %v253_v0 = vpop.xlane.xlu1 %252 }
  0xfc   :  { %v251_v1 = vpop.xlane.xlu0 %250  ;;  %v723_v12 = vpop.eup %722  ;;  %v451_v13 = vmul.f32 %v721_v19, %v1020_v34  ;;  %v331_v48 = vmax.f32 %v253_v0, 1e-24 }
  0xfd   :  { %v330_v49 = vmax.f32 %v251_v1, 1e-24  ;;  %v450_v26 = vmul.f32 %v723_v12, %v1022_v35  ;;  %v1233_v1 = vld [vmem:[#allocation17_spill] sm:$0xff] }
  0xfe   :  { %515 = vst [vmem:[#allocation5 + $0x148] sm:$0xff] %v451_v13  ;;  %579 = vst [vmem:[#allocation6 + $0x148] sm:$0xff] %v451_v13  ;;  %736 = vrsqrt.f32 %v331_v48 }
  0xff   :  { %v725_v27 = vpop.eup %724  ;;  %514 = vst [vmem:[#allocation5 + $0x140] sm:$0xff] %v450_v26  ;;  %578 = vst [vmem:[#allocation6 + $0x140] sm:$0xff] %v450_v26  ;;  %738 = vrsqrt.f32 %v330_v49  ;;  %v257_v28 = vpop.xlane.xlu1 %256  ;;  %v1234_v49 = vld [vmem:[#allocation18_spill] sm:$0xff] }
 0x100   :  { %v255_v29 = vpop.xlane.xlu0 %254  ;;  %v727_v46 = vpop.eup %726  ;;  %v453_v54 = vmul.f32 %v725_v27, %v1028_v42  ;;  %v333_v39 = vmax.f32 %v257_v28, 1e-24 }
 0x101   :  { %v332_v62 = vmax.f32 %v255_v29, 1e-24  ;;  %v452_v34 = vmul.f32 %v727_v46, %v1030_v43  ;;  %v1235_v29 = vld [vmem:[#allocation19_spill] sm:$0xff] }
 0x102   :  { %517 = vst [vmem:[#allocation5 + $0x158] sm:$0xff] %v453_v54  ;;  %581 = vst [vmem:[#allocation6 + $0x158] sm:$0xff] %v453_v54  ;;  %740 = vrsqrt.f32 %v333_v39  ;;  %v1236_v54 = vld [vmem:[#allocation20_spill] sm:$0xff] }
 0x103   :  { %v729_v35 = vpop.eup %728  ;;  %516 = vst [vmem:[#allocation5 + $0x150] sm:$0xff] %v452_v34  ;;  %580 = vst [vmem:[#allocation6 + $0x150] sm:$0xff] %v452_v34  ;;  %742 = vrsqrt.f32 %v332_v62  ;;  %v261_v52 = vpop.xlane.xlu1 %260 }
 0x104   :  { %v259_v53 = vpop.xlane.xlu0 %258  ;;  %v731_v55 = vpop.eup %730  ;;  %v455_v38 = vmul.f32 %v729_v35, %v1036_v50  ;;  %v335_v32 = vmax.f32 %v261_v52, 1e-24  ;;  %v1237_v35 = vld [vmem:[#allocation21_spill] sm:$0xff] }
 0x105   :  { %v334_v33 = vmax.f32 %v259_v53, 1e-24  ;;  %v454_v42 = vmul.f32 %v731_v55, %v1038_v51  ;;  %v1238_v53 = vld [vmem:[#allocation22_spill] sm:$0xff] }
 0x106   :  { %519 = vst [vmem:[#allocation5 + $0x168] sm:$0xff] %v455_v38  ;;  %583 = vst [vmem:[#allocation6 + $0x168] sm:$0xff] %v455_v38  ;;  %744 = vrsqrt.f32 %v335_v32 }
 0x107   :  { %v733_v43 = vpop.eup %732  ;;  %518 = vst [vmem:[#allocation5 + $0x160] sm:$0xff] %v454_v42  ;;  %582 = vst [vmem:[#allocation6 + $0x160] sm:$0xff] %v454_v42  ;;  %746 = vrsqrt.f32 %v334_v33  ;;  %v265_v16 = vpop.xlane.xlu1 %264  ;;  %v1239_v33 = vld [vmem:[#allocation23_spill] sm:$0xff] }
 0x108   :  { %v263_v17 = vpop.xlane.xlu0 %262  ;;  %v735_v56 = vpop.eup %734  ;;  %v457_v57 = vmul.f32 %v733_v43, %v1044_v58  ;;  %v337_v2 = vmax.f32 %v265_v16, 1e-24  ;;  %v1240_v43 = vld [vmem:[#allocation24_spill] sm:$0xff] }
 0x109   :  { %v336_v5 = vmax.f32 %v263_v17, 1e-24  ;;  %v456_v50 = vmul.f32 %v735_v56, %v1046_v59 }
 0x10a   :  { %521 = vst [vmem:[#allocation5 + $0x178] sm:$0xff] %v457_v57  ;;  %585 = vst [vmem:[#allocation6 + $0x178] sm:$0xff] %v457_v57  ;;  %748 = vrsqrt.f32 %v337_v2  ;;  %v1241_v57 = vld [vmem:[#allocation25_spill] sm:$0xff] }
 0x10b   :  { %v737_v51 = vpop.eup %736  ;;  %520 = vst [vmem:[#allocation5 + $0x170] sm:$0xff] %v456_v50  ;;  %584 = vst [vmem:[#allocation6 + $0x170] sm:$0xff] %v456_v50  ;;  %750 = vrsqrt.f32 %v336_v5  ;;  %v269_v23 = vpop.xlane.xlu1 %268  ;;  %v1242_v5 = vld [vmem:[#allocation26_spill] sm:$0xff] }
 0x10c   :  { %v267_v22 = vpop.xlane.xlu0 %266  ;;  %v739_v36 = vpop.eup %738  ;;  %v459_v60 = vmul.f32 %v737_v51, %v1227_v37  ;;  %v339_v61 = vmax.f32 %v269_v23, 1e-24 }
 0x10d   :  { %v338_v63 = vmax.f32 %v267_v22, 1e-24  ;;  %v458_v58 = vmul.f32 %v739_v36, %v1228_v7 }
 0x10e   :  { %523 = vst [vmem:[#allocation5 + $0x188] sm:$0xff] %v459_v60  ;;  %587 = vst [vmem:[#allocation6 + $0x188] sm:$0xff] %v459_v60  ;;  %752 = vrsqrt.f32 %v339_v61 }
 0x10f   :  { %v741_v59 = vpop.eup %740  ;;  %522 = vst [vmem:[#allocation5 + $0x180] sm:$0xff] %v458_v58  ;;  %586 = vst [vmem:[#allocation6 + $0x180] sm:$0xff] %v458_v58  ;;  %754 = vrsqrt.f32 %v338_v63  ;;  %v273_v20 = vpop.xlane.xlu1 %272 }
 0x110   :  { %v271_v21 = vpop.xlane.xlu0 %270  ;;  %v743_v30 = vpop.eup %742  ;;  %v461_v3 = vmul.f32 %v741_v59, %v1229_v31  ;;  %v341_v4 = vmax.f32 %v273_v20, 1e-24 }
 0x111   :  { %v340_v40 = vmax.f32 %v271_v21, 1e-24  ;;  %v460_v8 = vmul.f32 %v743_v30, %v1230_v41 }
 0x112   :  { %525 = vst [vmem:[#allocation5 + $0x198] sm:$0xff] %v461_v3  ;;  %589 = vst [vmem:[#allocation6 + $0x198] sm:$0xff] %v461_v3  ;;  %756 = vrsqrt.f32 %v341_v4 }
 0x113   :  { %v745_v9 = vpop.eup %744  ;;  %524 = vst [vmem:[#allocation5 + $0x190] sm:$0xff] %v460_v8  ;;  %588 = vst [vmem:[#allocation6 + $0x190] sm:$0xff] %v460_v8  ;;  %758 = vrsqrt.f32 %v340_v40  ;;  %v277_v14 = vpop.xlane.xlu1 %276 }
 0x114   :  { %v275_v6 = vpop.xlane.xlu0 %274  ;;  %v747_v10 = vpop.eup %746  ;;  %v463_v24 = vmul.f32 %v745_v9, %v1231_v11  ;;  %v343_v25 = vmax.f32 %v277_v14, 1e-24 }
 0x115   :  { %v342_v44 = vmax.f32 %v275_v6, 1e-24  ;;  %v462_v15 = vmul.f32 %v747_v10, %v1232_v45 }
 0x116   :  { %527 = vst [vmem:[#allocation5 + $0x1a8] sm:$0xff] %v463_v24  ;;  %591 = vst [vmem:[#allocation6 + $0x1a8] sm:$0xff] %v463_v24  ;;  %760 = vrsqrt.f32 %v343_v25 }
 0x117   :  { %v749_v47 = vpop.eup %748  ;;  %526 = vst [vmem:[#allocation5 + $0x1a0] sm:$0xff] %v462_v15  ;;  %590 = vst [vmem:[#allocation6 + $0x1a0] sm:$0xff] %v462_v15  ;;  %762 = vrsqrt.f32 %v342_v44  ;;  %v281_v18 = vpop.xlane.xlu1 %280 }
 0x118   :  { %v279_v19 = vpop.xlane.xlu0 %278  ;;  %v751_v0 = vpop.eup %750  ;;  %v465_v12 = vmul.f32 %v749_v47, %v1233_v1  ;;  %v345_v13 = vmax.f32 %v281_v18, 1e-24 }
 0x119   :  { %v344_v48 = vmax.f32 %v279_v19, 1e-24  ;;  %v464_v26 = vmul.f32 %v751_v0, %v1234_v49 }
 0x11a   :  { %529 = vst [vmem:[#allocation5 + $0x1b8] sm:$0xff] %v465_v12  ;;  %593 = vst [vmem:[#allocation6 + $0x1b8] sm:$0xff] %v465_v12  ;;  %764 = vrsqrt.f32 %v345_v13 }
 0x11b   :  { %v753_v27 = vpop.eup %752  ;;  %528 = vst [vmem:[#allocation5 + $0x1b0] sm:$0xff] %v464_v26  ;;  %592 = vst [vmem:[#allocation6 + $0x1b0] sm:$0xff] %v464_v26  ;;  %766 = vrsqrt.f32 %v344_v48 }
 0x11c   :  { %v755_v28 = vpop.eup %754  ;;  %v467_v46 = vmul.f32 %v753_v27, %v1235_v29 }
 0x11d   :  { %v466_v39 = vmul.f32 %v755_v28, %v1236_v54 }
 0x11e   :  { %531 = vst [vmem:[#allocation5 + $0x1c8] sm:$0xff] %v467_v46  ;;  %595 = vst [vmem:[#allocation6 + $0x1c8] sm:$0xff] %v467_v46 }
 0x11f   :  { %v757_v62 = vpop.eup %756  ;;  %530 = vst [vmem:[#allocation5 + $0x1c0] sm:$0xff] %v466_v39  ;;  %594 = vst [vmem:[#allocation6 + $0x1c0] sm:$0xff] %v466_v39 }
 0x120   :  { %v759_v34 = vpop.eup %758  ;;  %v469_v52 = vmul.f32 %v757_v62, %v1237_v35 }
 0x121   :  { %v468_v55 = vmul.f32 %v759_v34, %v1238_v53 }
 0x122   :  { %533 = vst [vmem:[#allocation5 + $0x1d8] sm:$0xff] %v469_v52  ;;  %597 = vst [vmem:[#allocation6 + $0x1d8] sm:$0xff] %v469_v52 }
 0x123   :  { %v761_v38 = vpop.eup %760  ;;  %532 = vst [vmem:[#allocation5 + $0x1d0] sm:$0xff] %v468_v55  ;;  %596 = vst [vmem:[#allocation6 + $0x1d0] sm:$0xff] %v468_v55 }
 0x124   :  { %v763_v32 = vpop.eup %762  ;;  %v471_v42 = vmul.f32 %v761_v38, %v1239_v33 }
 0x125   :  { %v470_v16 = vmul.f32 %v763_v32, %v1240_v43 }
 0x126   :  { %535 = vst [vmem:[#allocation5 + $0x1e8] sm:$0xff] %v471_v42  ;;  %599 = vst [vmem:[#allocation6 + $0x1e8] sm:$0xff] %v471_v42 }
 0x127   :  { %v765_v17 = vpop.eup %764  ;;  %534 = vst [vmem:[#allocation5 + $0x1e0] sm:$0xff] %v470_v16  ;;  %598 = vst [vmem:[#allocation6 + $0x1e0] sm:$0xff] %v470_v16 }
 0x128   :  { %v767_v56 = vpop.eup %766  ;;  %v473_v2 = vmul.f32 %v765_v17, %v1241_v57 }
 0x129   :  { %v472_v50 = vmul.f32 %v767_v56, %v1242_v5 }
 0x12a   :  { %537 = vst [vmem:[#allocation5 + $0x1f8] sm:$0xff] %v473_v2  ;;  %601 = vst [vmem:[#allocation6 + $0x1f8] sm:$0xff] %v473_v2 }
 0x12b   :  { %536 = vst [vmem:[#allocation5 + $0x1f0] sm:$0xff] %v472_v50  ;;  %600 = vst [vmem:[#allocation6 + $0x1f0] sm:$0xff] %v472_v50 }
 0x12c   :  { %799 = shalt.err (!%p796_p9)
}
 0x12d   :  { %613 = dma.vmem_to_hbm [thread:$0]  %s608_s16, 8192, %s1193_s1, [#allocation4], %s835_s12, %s835_s12, %s836_s13  }
 0x12e   :  { %s808_s22 = scalar_lea.vmem %s620_s18, 8192  ;;  %p813_p11 = scmp.lt.s32.totalorder %s620_s18, %s620_s18 }
 0x12f   :  { %p809_p10 = scmp.ne.s32.totalorder %s620_s18, %s808_s22  ;;  %p814_p12 = scmp.lt.s32.totalorder %s808_s22, %s808_s22 }
 0x131   :  { %p815_p13 = por %p814_p12, %p813_p11 }
 0x133   :  { %p816_p0 = pnand %p815_p13, %p809_p10 }
 0x135   :  { %819 = shalt.err (!%p816_p0)
}
 0x136   :  { %625 = dma.vmem_to_hbm [thread:$0]  %s620_s18, 8192, %s1194_s2, [#allocation7], %s835_s12, %s835_s12, %s836_s13  }
 0x137   :  { %830 = dma.done.wait [#allocation4], 8192  }
 0x138   :  { %831 = vsyncadd [#allocation4], 4294959104 }
 0x139   :  { %832 = dma.done.wait [#allocation7], 8192  }
 0x13a   :  { %833 = vsyncadd [#allocation7], 4294959104 }
 0x13b   :  { %632 = vsyncpa [#allocation3], 1 }
 0x13c   :  { %633 = vsyncpa [#allocation4], 1 }
 0x13d   :  { %634 = vsyncpa [#allocation7], 1 }

</bundles_post_ra>
